<compile_context>
chip_gen: v5e
topology: v5e:2x2
jax: 0.10.0
libtpu: 0.0.40
codegen_flags: <defaults>
</compile_context>

<pallas_src>
import functools

import jax
import jax.numpy as jnp
from jax import lax
from jax.experimental import pallas as pl
from jax.experimental.pallas import tpu as pltpu

ALPHA = 1.0
GAMMA = 0.5
LANE = 128
MAX_ROWS_PER_BLOCK = 8192          # (8192, 128) f32 block = 4 MiB per input per buffer
VMEM_LIMIT_BYTES = 40 * 1024 * 1024  # > 2 inputs x 2 bufs x 4 MiB; < v7x 64 MiB physical


def _n_tensorcores():
    """2 on v7x-class chips (2 TCs/chip), else 1 (v5e/v6e)."""
    try:
        kind = jax.devices()[0].device_kind.lower()
    except Exception:  # pragma: no cover - defensive
        return 1
    return 2 if "v7" in kind else 1


def _bce_partial_kernel(x_ref, t_ref, out_ref, acc_ref, *,
                        rows, tm, acc_rows, steps_per_split):
    c = pl.program_id(0)            # split index            ("parallel")
    i = pl.program_id(1)            # step within the split  ("arbitrary")

    @pl.when(i == 0)
    def _():
        acc_ref[...] = jnp.zeros_like(acc_ref)

    # Cast to f32 in-kernel (inputs may be bf16/f32 in HBM).
    x = x_ref[...].astype(jnp.float32)
    t = t_ref[...].astype(jnp.float32)

    # Numerically stable BCE-with-logits (matches torch.nn.BCEWithLogitsLoss):
    #   max(x, 0) - x*t + log1p(exp(-|x|))
    bce = jnp.maximum(x, 0.0) - x * t + jnp.log1p(jnp.exp(-jnp.abs(x)))

    def fold(v):
        # (tm, LANE) -> (acc_rows, LANE): pure cross-vreg VPU add tree.
        if acc_rows == tm:
            return v
        return v.reshape(tm // acc_rows, acc_rows, LANE).sum(axis=0)

    gb = c * steps_per_split + i                 # global block index (row blocks)
    block_is_full = (gb + 1) * tm <= rows        # entirely inside the valid rows?

    @pl.when(block_is_full)
    def _():
        # Hot path: no iota / compare / select work at all.
        acc_ref[...] += fold(bce)

    @pl.when(jnp.logical_not(block_is_full))
    def _():
        # Covers both the last partial block and any clamped over-range block
        # (whose index_map was clamped to the final block): rows past `rows`
        # contribute exactly 0 even if the padded VMEM data is NaN/Inf.
        row = lax.broadcasted_iota(jnp.int32, (tm, LANE), 0)
        valid = (gb * tm + row) < rows
        acc_ref[...] += fold(jnp.where(valid, bce, 0.0))

    @pl.when(i == pl.num_programs(1) - 1)
    def _():
        # Lane-dense per-split partial (acc_rows x 128 f32, <= 4 KiB).
        out_ref[...] = acc_ref[...].reshape(1, acc_rows, LANE)


def _bce_sum_pallas(x2, t2, rows):
    """Sum of elementwise BCE-with-logits over a (rows, 128) array."""
    # Row tile: multiple of 8 (valid f32/bf16 sublane tiling) unless the whole
    # array is smaller than 8 rows, in which case the block equals the array.
    if rows >= 8:
        tm = min(MAX_ROWS_PER_BLOCK, (rows // 8) * 8)
    else:
        tm = rows
    acc_rows = 8 if tm % 8 == 0 else tm

    n_blocks = pl.cdiv(rows, tm)
    n_splits = min(_n_tensorcores(), n_blocks)
    steps_per_split = pl.cdiv(n_blocks, n_splits)

    def in_map(c, i):
        # Clamp so we never DMA a block fully past the array end; such blocks
        # (and the last partial one) are zeroed by the in-kernel row mask.
        return (jnp.minimum(c * steps_per_split + i, n_blocks - 1), 0)

    kernel = functools.partial(
        _bce_partial_kernel,
        rows=rows, tm=tm, acc_rows=acc_rows, steps_per_split=steps_per_split,
    )

    n_elems = rows * LANE
    bytes_accessed = (x2.size * x2.dtype.itemsize
                      + t2.size * t2.dtype.itemsize
                      + n_splits * acc_rows * LANE * 4)
    cost = pl.CostEstimate(
        flops=8 * n_elems,
        transcendentals=2 * n_elems,
        bytes_accessed=int(bytes_accessed),
    )

    # TODO(synk): on v7x, verify "parallel" actually shards the split axis
    # across both TensorCores (xprof); if not, switch to pltpu.CORE_PARALLEL
    # or drop the split when one TC already saturates HBM.
    partials = pl.pallas_call(
        kernel,
        out_shape=jax.ShapeDtypeStruct((n_splits, acc_rows, LANE), jnp.float32),
        grid_spec=pltpu.PrefetchScalarGridSpec(
            num_scalar_prefetch=0,
            grid=(n_splits, steps_per_split),
            in_specs=[
                pl.BlockSpec((tm, LANE), in_map),
                pl.BlockSpec((tm, LANE), in_map),
            ],
            out_specs=pl.BlockSpec((1, acc_rows, LANE), lambda c, i: (c, 0, 0)),
            scratch_shapes=[pltpu.VMEM((acc_rows, LANE), jnp.float32)],
        ),
        compiler_params=pltpu.CompilerParams(
            dimension_semantics=("parallel", "arbitrary"),
            vmem_limit_bytes=VMEM_LIMIT_BYTES,
        ),
        cost_estimate=cost,
    )(x2, t2)

    return jnp.sum(partials, dtype=jnp.float32)


def focal_loss(inputs, targets, alpha=ALPHA, gamma=GAMMA, reduce=False):
    assert inputs.shape == targets.shape
    n = int(inputs.size)

    x_flat = inputs.reshape(-1)
    t_flat = targets.reshape(-1)

    rows = n // LANE
    tail = n - rows * LANE

    total = jnp.float32(0.0)

    if rows > 0:
        if tail == 0:
            # Free reshape, zero extra HBM traffic.
            x2 = x_flat.reshape(rows, LANE)
            t2 = t_flat.reshape(rows, LANE)
        else:
            # Lane-aligned prefix only (no pad values ever written); the tiny
            # tail is handled below in plain jnp.
            x2 = x_flat[: rows * LANE].reshape(rows, LANE)
            t2 = t_flat[: rows * LANE].reshape(rows, LANE)
        total = total + _bce_sum_pallas(x2, t2, rows)

    if tail > 0:
        # < 128 elements: negligible jnp reduction in the wrapper.
        xt = x_flat[rows * LANE:].astype(jnp.float32)
        tt = t_flat[rows * LANE:].astype(jnp.float32)
        bce_t = jnp.maximum(xt, 0.0) - xt * tt + jnp.log1p(jnp.exp(-jnp.abs(xt)))
        total = total + jnp.sum(bce_t, dtype=jnp.float32)

    # Scalar finalize (identical to the PyTorch module).
    ce = total / jnp.float32(n)
    pt = jnp.exp(-ce)
    loss = alpha * (1.0 - pt) ** gamma * ce
    # reduce=True -> torch.mean of an already-scalar tensor (identity).
    return loss


def focal_loss_ref(inputs, targets, alpha=ALPHA, gamma=GAMMA):
    x = inputs.astype(jnp.float32)
    t = targets.astype(jnp.float32)
    bce = jnp.maximum(x, 0.0) - x * t + jnp.log1p(jnp.exp(-jnp.abs(x)))
    ce = jnp.mean(bce)
    pt = jnp.exp(-ce)
    return alpha * (1.0 - pt) ** gamma * ce


if __name__ == "__main__":
    key = jax.random.PRNGKey(0)
    k1, k2 = jax.random.split(key)

    # Small NCHW-shaped logits and binary targets.
    x = jax.random.normal(k1, (2, 4, 16, 16), dtype=jnp.float32)
    t = (jax.random.uniform(k2, (2, 4, 16, 16)) > 0.5).astype(jnp.float32)

    out = jax.block_until_ready(focal_loss(x, t))
    ref = focal_loss_ref(x, t)

    assert jnp.allclose(out, ref, rtol=1e-5, atol=1e-6), (out, ref)
    print("KERNEL_OK")
</pallas_src>

<mosaic_0001>
module attributes {stable_mosaic.version = 11 : i64} {
  func.func @_bce_partial_kernel(%arg0: i32, %arg1: i32, %arg2: memref<16x128xf32, #tpu.memory_space<vmem>>, %arg3: memref<16x128xf32, #tpu.memory_space<vmem>>, %arg4: memref<1x8x128xf32, #tpu.memory_space<vmem>>, %arg5: memref<8x128xf32, #tpu.memory_space<vmem>>) attributes {dimension_semantics = [#tpu.dimension_semantics<parallel>, #tpu.dimension_semantics<arbitrary>], iteration_bounds = array<i64: 1, 1>, scalar_prefetch = 0 : i64, scratch_operands = 1 : i64, tpu.core_type = #tpu.core_type<tc>, window_params = [{transform_indices = @transform_0, window_bounds = array<i64: 16, 128>}, {transform_indices = @transform_1, window_bounds = array<i64: 16, 128>}, {transform_indices = @transform_2, window_bounds = array<i64: 1, 8, 128>}]} {
    %c0_i32 = arith.constant 0 : i32
    %0 = arith.cmpi eq, %arg1, %c0_i32 : i32
    %1 = arith.extui %0 : i1 to i32
    %c0_i32_0 = arith.constant 0 : i32
    %2 = arith.cmpi ne, %1, %c0_i32_0 : i32
    scf.if %2 {
      %cst_11 = arith.constant 0.000000e+00 : f32
      %28 = vector.broadcast %cst_11 : f32 to vector<8x128xf32>
      %c0_12 = arith.constant 0 : index
      %c0_13 = arith.constant 0 : index
      %29 = vector.load %arg5[%c0_12, %c0_13] : memref<8x128xf32, #tpu.memory_space<vmem>>, vector<8x128xf32>
      tpu.vector_store %arg5[%c0_12, %c0_13], %28 {strides = array<i32>} : memref<8x128xf32, #tpu.memory_space<vmem>>, vector<8x128xf32>,
    } else {
    }
    %c0 = arith.constant 0 : index
    %c0_1 = arith.constant 0 : index
    %3 = vector.load %arg2[%c0, %c0_1] : memref<16x128xf32, #tpu.memory_space<vmem>>, vector<16x128xf32>
    %c0_2 = arith.constant 0 : index
    %c0_3 = arith.constant 0 : index
    %4 = vector.load %arg3[%c0_2, %c0_3] : memref<16x128xf32, #tpu.memory_space<vmem>>, vector<16x128xf32>
    %cst = arith.constant 0.000000e+00 : f32
    %5 = vector.broadcast %cst : f32 to vector<16x128xf32>
    %6 = arith.maximumf %3, %5 : vector<16x128xf32>
    %7 = arith.mulf %3, %4 : vector<16x128xf32>
    %8 = arith.subf %6, %7 : vector<16x128xf32>
    %9 = math.absf %3 : vector<16x128xf32>
    %cst_4 = arith.constant 0.000000e+00 : f32
    %10 = vector.broadcast %cst_4 : f32 to vector<16x128xf32>
    %11 = arith.subf %10, %9 : vector<16x128xf32>
    %12 = math.exp %11 : vector<16x128xf32>
    %13 = math.log1p %12 : vector<16x128xf32>
    %14 = arith.addf %8, %13 : vector<16x128xf32>
    %c1_i32 = arith.constant 1 : i32
    %15 = arith.muli %arg0, %c1_i32 : i32
    %16 = arith.addi %15, %arg1 : i32
    %c1_i32_5 = arith.constant 1 : i32
    %17 = arith.addi %16, %c1_i32_5 : i32
    %c16_i32 = arith.constant 16 : i32
    %18 = arith.muli %17, %c16_i32 : i32
    %c16_i32_6 = arith.constant 16 : i32
    %19 = arith.cmpi sle, %18, %c16_i32_6 : i32
    %20 = arith.extui %19 : i1 to i32
    %c0_i32_7 = arith.constant 0 : i32
    %21 = arith.cmpi ne, %20, %c0_i32_7 : i32
    scf.if %21 {
      %c0_11 = arith.constant 0 : index
      %c0_12 = arith.constant 0 : index
      %28 = vector.load %arg5[%c0_11, %c0_12] : memref<8x128xf32, #tpu.memory_space<vmem>>, vector<8x128xf32>
      %29 = vector.shape_cast %14 : vector<16x128xf32> to vector<2x8x128xf32>
      %cst_13 = arith.constant dense<0.000000e+00> : vector<8x128xf32>
      %30 = vector.multi_reduction <add>, %29, %cst_13 [0] : vector<2x8x128xf32> to vector<8x128xf32>
      %31 = arith.addf %28, %30 : vector<8x128xf32>
      %c0_14 = arith.constant 0 : index
      %c0_15 = arith.constant 0 : index
      %32 = vector.load %arg5[%c0_14, %c0_15] : memref<8x128xf32, #tpu.memory_space<vmem>>, vector<8x128xf32>
      tpu.vector_store %arg5[%c0_14, %c0_15], %31 {strides = array<i32>} : memref<8x128xf32, #tpu.memory_space<vmem>>, vector<8x128xf32>,
    } else {
    }
    %true = arith.constant true
    %22 = arith.xori %19, %true : i1
    %23 = arith.extui %22 : i1 to i32
    %c0_i32_8 = arith.constant 0 : i32
    %24 = arith.cmpi ne, %23, %c0_i32_8 : i32
    scf.if %24 {
      %28 = tpu.iota {dimensions = array<i32: 0>} : vector<16x128xi32>
      %c16_i32_11 = arith.constant 16 : i32
      %29 = arith.muli %16, %c16_i32_11 : i32
      %30 = vector.broadcast %29 : i32 to vector<16x128xi32>
      %31 = arith.addi %30, %28 : vector<16x128xi32>
      %c16_i32_12 = arith.constant 16 : i32
      %32 = vector.broadcast %c16_i32_12 : i32 to vector<16x128xi32>
      %33 = arith.cmpi slt, %31, %32 : vector<16x128xi32>
      %c0_13 = arith.constant 0 : index
      %c0_14 = arith.constant 0 : index
      %34 = vector.load %arg5[%c0_13, %c0_14] : memref<8x128xf32, #tpu.memory_space<vmem>>, vector<8x128xf32>
      %cst_15 = arith.constant 0.000000e+00 : f32
      %35 = vector.broadcast %cst_15 : f32 to vector<16x128xf32>
      %36 = arith.select %33, %14, %35 : vector<16x128xi1>, vector<16x128xf32>
      %37 = vector.shape_cast %36 : vector<16x128xf32> to vector<2x8x128xf32>
      %cst_16 = arith.constant dense<0.000000e+00> : vector<8x128xf32>
      %38 = vector.multi_reduction <add>, %37, %cst_16 [0] : vector<2x8x128xf32> to vector<8x128xf32>
      %39 = arith.addf %34, %38 : vector<8x128xf32>
      %c0_17 = arith.constant 0 : index
      %c0_18 = arith.constant 0 : index
      %40 = vector.load %arg5[%c0_17, %c0_18] : memref<8x128xf32, #tpu.memory_space<vmem>>, vector<8x128xf32>
      tpu.vector_store %arg5[%c0_17, %c0_18], %39 {strides = array<i32>} : memref<8x128xf32, #tpu.memory_space<vmem>>, vector<8x128xf32>,
    } else {
    }
    %c0_i32_9 = arith.constant 0 : i32
    %25 = arith.cmpi eq, %arg1, %c0_i32_9 : i32
    %26 = arith.extui %25 : i1 to i32
    %c0_i32_10 = arith.constant 0 : i32
    %27 = arith.cmpi ne, %26, %c0_i32_10 : i32
    scf.if %27 {
      %c0_11 = arith.constant 0 : index
      %c0_12 = arith.constant 0 : index
      %28 = vector.load %arg5[%c0_11, %c0_12] : memref<8x128xf32, #tpu.memory_space<vmem>>, vector<8x128xf32>
      %29 = vector.shape_cast %28 : vector<8x128xf32> to vector<1x8x128xf32>
      %c0_13 = arith.constant 0 : index
      %c0_14 = arith.constant 0 : index
      %c0_15 = arith.constant 0 : index
      %30 = vector.load %arg4[%c0_13, %c0_14, %c0_15] : memref<1x8x128xf32, #tpu.memory_space<vmem>>, vector<1x8x128xf32>
      tpu.vector_store %arg4[%c0_13, %c0_14, %c0_15], %29 {strides = array<i32>} : memref<1x8x128xf32, #tpu.memory_space<vmem>>, vector<1x8x128xf32>,
    } else {
    }
    return
  }
  func.func @transform_0(%arg0: i32, %arg1: i32) -> (i32, i32) {
    %c1_i32 = arith.constant 1 : i32
    %0 = arith.muli %arg0, %c1_i32 : i32
    %1 = arith.addi %0, %arg1 : i32
    %c0_i32 = arith.constant 0 : i32
    %2 = arith.minsi %1, %c0_i32 : i32
    %c0_i32_0 = arith.constant 0 : i32
    %c0_i32_1 = arith.constant 0 : i32
    return %2, %c0_i32_0 : i32, i32
  }
  func.func @transform_1(%arg0: i32, %arg1: i32) -> (i32, i32) {
    %c1_i32 = arith.constant 1 : i32
    %0 = arith.muli %arg0, %c1_i32 : i32
    %1 = arith.addi %0, %arg1 : i32
    %c0_i32 = arith.constant 0 : i32
    %2 = arith.minsi %1, %c0_i32 : i32
    %c0_i32_0 = arith.constant 0 : i32
    %c0_i32_1 = arith.constant 0 : i32
    return %2, %c0_i32_0 : i32, i32
  }
  func.func @transform_2(%arg0: i32, %arg1: i32) -> (i32, i32, i32) {
    %c0_i32 = arith.constant 0 : i32
    %c0_i32_0 = arith.constant 0 : i32
    %c0_i32_1 = arith.constant 0 : i32
    return %arg0, %c0_i32, %c0_i32_0 : i32, i32, i32
  }
}

</mosaic_0001>

<bundles_post_ra>
// kernel: tpu_custom_call.1
= control target key start
LH: loop header
LB: loop body
LE: loop exit
PB: predicated region body
PF: predicated region fallthrough
CT: control target
= control target key end

     0   :  { %7 = vsyncpa [#allocation4], 0  ;;  %s284_s0 = inlined_call_operand.hbm [shape: f32[16,128], index: 0, kind: input, shape index: {}]   ;;  %s285_s1 = inlined_call_operand.hbm [shape: f32[16,128], index: 1, kind: input, shape index: {}]   ;;  %s286_s2 = inlined_call_operand.hbm [shape: f32[1,8,128], index: 2, kind: output, shape index: {}]  }
   0x1   :  { %8 = vsyncpa [#allocation7], 0 }
   0x2   :  { %9 = vsyncpa [#allocation5], 0  ;;  %s20_s11 = sshll.u32 %s284_s0, 4  ;;  %s255_s12 = smov [#allocation3]   ;;  %s21_s11 = int_to_ptr.hbm [resolvable:$true] %s20_s11 }
   0x3   :  { %s22_s13 = sshll.u32 %s255_s12, 4  ;;  %s39_s16 = sshll.u32 %s285_s1, 4  ;;  %s23_s13 = int_to_ptr.vmem [resolvable:$true] %s22_s13  ;;  %s40_s16 = int_to_ptr.hbm [resolvable:$true] %s39_s16 }
   0x4   :  { %s256_s17 = smov 128   ;;  %s257_s18 = smov 8  }
   0x5   :  { %28 = dma.hbm_to_vmem [thread:$0]  %s21_s11, 256, %s23_s13, [#allocation4], %s256_s17, %s256_s17, %s257_s18  }
   0x6   :  { %s258_s19 = smov [#allocation6]  }
   0x7   :  { %s41_s20 = sshll.u32 %s258_s19, 4  ;;  %s42_s20 = int_to_ptr.vmem [resolvable:$true] %s41_s20 }
   0x8   :  { %47 = dma.hbm_to_vmem [thread:$0]  %s40_s16, 256, %s42_s20, [#allocation7], %s256_s17, %s256_s17, %s257_s18  }
   0x9   :  { %249 = dma.done.wait [#allocation4], 256  }
   0xa   :  { %250 = vsyncadd [#allocation4], 4294967040 }
   0xb   :  { %251 = dma.done.wait [#allocation7], 256  }
   0xc   :  { %252 = vsyncadd [#allocation7], 4294967040  ;;  %v69_v0 = vld [vmem:[#allocation3] sm:$0xff]  ;;  %v70_v1 = vld [vmem:[#allocation3 + $0x8] sm:$0xff]  ;;  %s259_s0 = smov [#allocation8]   ;;  %s149_s23 = sshll.u32 %s286_s2, 4  ;;  %s150_s23 = int_to_ptr.hbm [resolvable:$true] %s149_s23 }
   0xd   :  { %v79_v2 = vand.u32 2147483647, %v69_v0  ;;  %v80_v3 = vand.u32 2147483647, %v70_v1  ;;  %v71_v12 = vld [vmem:[#allocation6] sm:$0xff]  ;;  %v72_v15 = vld [vmem:[#allocation6 + $0x8] sm:$0xff] }
   0xe   :  { %v73_v17 = vmax.f32 %v69_v0, 0.0  ;;  %v75_v18 = vmul.f32 %v71_v12, %v69_v0  ;;  %v74_v21 = vmax.f32 %v70_v1, 0.0  ;;  %v76_v22 = vmul.f32 %v72_v15, %v70_v1  ;;  %s147_s1 = sshll.u32 %s259_s0, 4  ;;  %s148_s1 = int_to_ptr.vmem [resolvable:$true] %s147_s1 }
   0xf   :  { %v81_v4 = vsub.f32 0.0, %v79_v2  ;;  %v82_v5 = vsub.f32 0.0, %v80_v3 }
  0x10   :  { %v77_v26 = vsub.f32 %v73_v17, %v75_v18  ;;  %v78_v29 = vsub.f32 %v74_v21, %v76_v22 }
  0x11   :  { %v83_v6 = vmul.f32 1.442695, %v81_v4  ;;  %v85_v7 = vmul.f32 1.442695, %v82_v5 }
  0x13   :  { %169 = vpow2.f32 %v83_v6 }
  0x14   :  { %171 = vpow2.f32 %v85_v7 }
  0x19   :  { %v170_v8 = vpop.eup %169 }
  0x1a   :  { %v172_v9 = vpop.eup %171  ;;  %v87_v10 = vadd.f32 1.0, %v170_v8  ;;  %v90_v11 = vmul.f32 -0.5, %v170_v8  ;;  %v93_v19 = vand.u32 2147483647, %v170_v8 }
  0x1b   :  { %v96_v13 = vadd.f32 1.0, %v172_v9  ;;  %v99_v14 = vmul.f32 -0.5, %v172_v9  ;;  %v102_v23 = vand.u32 2147483647, %v172_v9 }
  0x1c   :  { %173 = vlog2.f32 %v87_v10  ;;  %v91_v16 = vadd.f32 1.0, %v90_v11  ;;  %vm94_vm0 = vcmp.lt.f32.partialorder %v93_v19, 0.0004427343 }
  0x1d   :  { %175 = vlog2.f32 %v96_v13  ;;  %v100_v20 = vadd.f32 1.0, %v99_v14  ;;  %vm103_vm1 = vcmp.lt.f32.partialorder %v102_v23, 0.0004427343 }
  0x1e   :  { %v92_v24 = vmul.f32 %v170_v8, %v91_v16 }
  0x1f   :  { %v101_v27 = vmul.f32 %v172_v9, %v100_v20 }
  0x22   :  { %v174_v25 = vpop.eup %173 }
  0x23   :  { %v176_v28 = vpop.eup %175  ;;  %v89_v30 = vmul.f32 0.6931472, %v174_v25 }
  0x24   :  { %v98_v31 = vmul.f32 0.6931472, %v176_v28 }
  0x25   :  { %v95_v32 = vsel %vm94_vm0, %v92_v24, %v89_v30 }
  0x26   :  { %v104_v33 = vsel %vm103_vm1, %v101_v27, %v98_v31  ;;  %v105_v34 = vadd.f32 %v95_v32, %v77_v26 }
  0x27   :  { %v106_v35 = vadd.f32 %v104_v33, %v78_v29 }
  0x29   :  { %v115_v36 = vadd.f32 %v106_v35, %v105_v34 }
  0x2b   :  { %141 = vst [vmem:[#allocation8] sm:$0xff] %v115_v36 }
  0x2c   :  { %152 = dma.vmem_to_hbm [thread:$0]  %s148_s1, 128, %s150_s23, [#allocation5]  }
  0x2d   :  { %253 = dma.done.wait [#allocation5], 128  }
  0x2e   :  { %254 = vsyncadd [#allocation5], 4294967168 }
  0x2f   :  { %157 = vsyncpa [#allocation4], 1 }
  0x30   :  { %158 = vsyncpa [#allocation7], 1 }
  0x31   :  { %159 = vsyncpa [#allocation5], 1 }

</bundles_post_ra>
